<compile_context>
chip_gen: v5e
topology: v5e:2x2
jax: 0.10.0
libtpu: 0.0.40
codegen_flags: <defaults>
</compile_context>

<pallas_src>
import functools

import jax
import jax.numpy as jnp
from jax.experimental import pallas as pl
from jax.experimental.pallas import tpu as pltpu


def _round_up(x, m):
    return (x + m - 1) // m * m


# ---------------------------------------------------------------------------
# Primary path: vocab-tiled one-hot gather on the MXU.
# ---------------------------------------------------------------------------
def _embedding_mxu_kernel(ids_ref, table_ref, out_ref, acc_ref, *, mxu_precision):
    # ids_ref:   (TILE_T, 1) int32  — token ids for this token tile
    # table_ref: (TILE_V, D)        — current vocab tile of the table
    # out_ref:   (TILE_T, D)        — output tile (written on last vocab step)
    # acc_ref:   (TILE_T, D) f32    — VMEM accumulator across vocab tiles
    v = pl.program_id(1)

    @pl.when(v == 0)
    def _():
        acc_ref[...] = jnp.zeros_like(acc_ref)

    tile_t = ids_ref.shape[0]
    tile_v = table_ref.shape[0]

    # Local one-hot for this vocab tile: onehot[t, j] = (ids[t] - v*TILE_V == j).
    local_ids = ids_ref[...] - v * tile_v                       # (TILE_T, 1)
    iota_v = jax.lax.broadcasted_iota(jnp.int32, (tile_t, tile_v), 1)
    onehot = (iota_v == local_ids).astype(table_ref.dtype)      # (TILE_T, TILE_V)

    acc_ref[...] += jnp.dot(
        onehot,
        table_ref[...],
        preferred_element_type=jnp.float32,
        precision=mxu_precision,
    )

    @pl.when(v == pl.num_programs(1) - 1)
    def _():
        out_ref[...] = acc_ref[...].astype(out_ref.dtype)


def _embedding_onehot_mxu(ids_flat, table, tile_t, tile_v, vmem_budget):
    N = ids_flat.shape[0]
    V, D = table.shape
    itemsize = jnp.dtype(table.dtype).itemsize

    # Token tile: MXU-friendly multiple of 128; shrink for tiny inputs but
    # never below 128 rows (8-row tiles use <7% of a 256x256 MXU).
    if N < tile_t:
        tile_t = max(128, _round_up(N, 128))
    tile_t = _round_up(tile_t, 128)

    # Vocab tile: bound the (TILE_V, D) table block (<= ~4 MiB) so per-step
    # VMEM is independent of vocabulary size.
    max_block_bytes = 4 << 20
    tile_v = min(tile_v, max(8, (max_block_bytes // max(1, D * itemsize)) // 8 * 8))
    tile_v = min(tile_v, _round_up(V, 8))
    tile_v = max(tile_v, 8)

    n_pad = _round_up(N, tile_t)
    v_pad = _round_up(V, tile_v)
    num_t = n_pad // tile_t
    num_v = v_pad // tile_v

    if n_pad != N:
        # Pad with id 0 (a valid row); padded rows are sliced off after the call.
        ids_flat = jnp.pad(ids_flat, (0, n_pad - N))
    ids_col = ids_flat.reshape(n_pad, 1)

    table_p = table
    if v_pad != V:
        # Zero rows: out-of-tile ids never select them (one-hot is 0 there).
        table_p = jnp.pad(table, ((0, v_pad - V), (0, 0)))

    est_vmem = (
        2 * tile_v * D * itemsize        # table tiles (double-buffered pipeline)
        + 2 * tile_t * D * itemsize      # output tiles
        + tile_t * D * 4                 # f32 accumulator scratch
        + 2 * tile_t * 4                 # ids tiles
        + tile_t * tile_v * 4            # one-hot temporary (worst case f32)
        + (2 << 20)                      # headroom
    )
    vmem_limit = int(min(max(est_vmem, 32 << 20), vmem_budget))

    # Exact gather for f32 tables; native bf16 MXU path otherwise.
    mxu_precision = (
        jax.lax.Precision.HIGHEST
        if table.dtype == jnp.float32
        else jax.lax.Precision.DEFAULT
    )
    kernel = functools.partial(_embedding_mxu_kernel, mxu_precision=mxu_precision)

    out_flat = pl.pallas_call(
        kernel,
        out_shape=jax.ShapeDtypeStruct((n_pad, D), table.dtype),
        grid_spec=pltpu.PrefetchScalarGridSpec(
            num_scalar_prefetch=0,
            grid=(num_t, num_v),
            in_specs=[
                pl.BlockSpec((tile_t, 1), lambda t, v: (t, 0)),   # ids tile
                pl.BlockSpec((tile_v, D), lambda t, v: (v, 0)),   # table tile
            ],
            out_specs=pl.BlockSpec((tile_t, D), lambda t, v: (t, 0)),
            scratch_shapes=[pltpu.VMEM((tile_t, D), jnp.float32)],
        ),
        compiler_params=pltpu.CompilerParams(
            dimension_semantics=("parallel", "arbitrary"),
            vmem_limit_bytes=vmem_limit,
        ),
    )(ids_col, table_p)

    if n_pad != N:
        out_flat = out_flat[:N]
    return out_flat


# ---------------------------------------------------------------------------
# Fallback path: scalar-prefetch driven DMA row gather (V >> N / huge tables).
# ---------------------------------------------------------------------------
def _row_gather_kernel(ids_ref, row_ref, out_ref):
    # ids_ref: (N,) int32 in SMEM (scalar prefetch, drives the index_maps)
    # row_ref: (1, D) — table row selected by ids[i]
    # out_ref: (1, D)
    del ids_ref
    out_ref[...] = row_ref[...]


def _embedding_row_gather(ids_flat, table, vmem_budget):
    N = ids_flat.shape[0]
    V, D = table.shape
    itemsize = jnp.dtype(table.dtype).itemsize
    est_vmem = 4 * D * itemsize + (2 << 20)
    vmem_limit = int(min(max(est_vmem, 32 << 20), vmem_budget))

    return pl.pallas_call(
        _row_gather_kernel,
        out_shape=jax.ShapeDtypeStruct((N, D), table.dtype),
        grid_spec=pltpu.PrefetchScalarGridSpec(
            num_scalar_prefetch=1,
            grid=(N,),
            in_specs=[pl.BlockSpec((1, D), lambda i, ids: (ids[i], 0))],
            out_specs=pl.BlockSpec((1, D), lambda i, ids: (i, 0)),
        ),
        compiler_params=pltpu.CompilerParams(
            dimension_semantics=("arbitrary",),
            vmem_limit_bytes=vmem_limit,
        ),
    )(ids_flat, table)


# ---------------------------------------------------------------------------
# Public wrapper (nn.Embedding forward semantics).
# ---------------------------------------------------------------------------
def embedding_lookup(input_ids, table, *, tile_t=256, tile_v=1024):
    """input_ids: int array of any shape -> [..., D] in table dtype.

    Matches PyTorch nn.Embedding forward for in-range ids.  (PyTorch raises on
    out-of-range ids; here an out-of-range id yields a zero row.)
    """
    V, D = table.shape
    lead_shape = tuple(input_ids.shape)
    N = 1
    for s in lead_shape:
        N *= int(s)
    ids_flat = input_ids.reshape(N).astype(jnp.int32)
    itemsize = jnp.dtype(table.dtype).itemsize

    # Generation-aware VMEM budget (v5e/v6e: 128 MiB, v7x: 64 MiB per TC).
    try:
        vmem_cap = int(pltpu.get_tpu_info().vmem_capacity_bytes)
    except Exception:
        vmem_cap = 64 << 20
    vmem_budget = int(0.85 * vmem_cap)

    table_bytes = V * D * itemsize
    gather_bytes = N * D * itemsize

    # Large table and V >> N: DMA row gather moves only ~N*D bytes instead of
    # streaming the full table through the MXU path once per token tile.
    if table_bytes > (8 << 20) and table_bytes > 4 * gather_bytes:
        out_flat = _embedding_row_gather(ids_flat, table, vmem_budget)
    else:
        out_flat = _embedding_onehot_mxu(ids_flat, table, tile_t, tile_v, vmem_budget)

    return out_flat.reshape(*lead_shape, D)


if __name__ == "__main__":
    # Small, deterministic setup consistent with EmbeddingModel(vocab_size, embedding_dim)
    vocab_size = 64
    embedding_dim = 32
    batch, seq = 2, 8

    key = jax.random.PRNGKey(0)
    k_table, k_ids = jax.random.split(key)

    # nn.Embedding default init: weight ~ N(0, 1)
    table = jax.random.normal(k_table, (vocab_size, embedding_dim), dtype=jnp.float32)
    input_ids = jax.random.randint(k_ids, (batch, seq), 0, vocab_size, dtype=jnp.int32)

    out = embedding_lookup(input_ids, table)
    out = jax.block_until_ready(out)

    # Reference: plain JAX gather (semantics of nn.Embedding forward)
    ref = table[input_ids]
    assert out.shape == (batch, seq, embedding_dim)
    assert jnp.allclose(out, ref), "embedding gather mismatch"

    print("KERNEL_OK")
</pallas_src>

<mosaic_0001>
module attributes {stable_mosaic.version = 11 : i64} {
  func.func @_embedding_mxu_kernel(%arg0: i32, %arg1: i32, %arg2: memref<128x1xi32, #tpu.memory_space<vmem>>, %arg3: memref<64x32xf32, #tpu.memory_space<vmem>>, %arg4: memref<128x32xf32, #tpu.memory_space<vmem>>, %arg5: memref<128x32xf32, #tpu.memory_space<vmem>>) attributes {dimension_semantics = [#tpu.dimension_semantics<parallel>, #tpu.dimension_semantics<arbitrary>], iteration_bounds = array<i64: 1, 1>, scalar_prefetch = 0 : i64, scratch_operands = 1 : i64, tpu.core_type = #tpu.core_type<tc>, window_params = [{transform_indices = @transform_0, window_bounds = array<i64: 128, 1>}, {transform_indices = @transform_1, window_bounds = array<i64: 64, 32>}, {transform_indices = @transform_2, window_bounds = array<i64: 128, 32>}]} {
    %c0_i32 = arith.constant 0 : i32
    %0 = arith.cmpi eq, %arg1, %c0_i32 : i32
    %1 = arith.extui %0 : i1 to i32
    %c0_i32_0 = arith.constant 0 : i32
    %2 = arith.cmpi ne, %1, %c0_i32_0 : i32
    scf.if %2 {
      %cst_10 = arith.constant 0.000000e+00 : f32
      %20 = vector.broadcast %cst_10 : f32 to vector<128x32xf32>
      %c0_11 = arith.constant 0 : index
      %c0_12 = arith.constant 0 : index
      %21 = vector.load %arg5[%c0_11, %c0_12] : memref<128x32xf32, #tpu.memory_space<vmem>>, vector<128x32xf32>
      tpu.vector_store %arg5[%c0_11, %c0_12], %20 {strides = array<i32>} : memref<128x32xf32, #tpu.memory_space<vmem>>, vector<128x32xf32>,
    } else {
    }
    %c0 = arith.constant 0 : index
    %c0_1 = arith.constant 0 : index
    %3 = vector.load %arg2[%c0, %c0_1] : memref<128x1xi32, #tpu.memory_space<vmem>>, vector<128x1xi32>
    %c64_i32 = arith.constant 64 : i32
    %4 = arith.muli %arg1, %c64_i32 : i32
    %5 = vector.broadcast %4 : i32 to vector<128x1xi32>
    %6 = arith.subi %3, %5 : vector<128x1xi32>
    %7 = tpu.iota {dimensions = array<i32: 1>} : vector<128x64xi32>
    %8 = vector.broadcast %6 : vector<128x1xi32> to vector<128x64xi32>
    %9 = arith.cmpi eq, %7, %8 : vector<128x64xi32>
    %10 = arith.extui %9 : vector<128x64xi1> to vector<128x64xi32>
    %11 = arith.sitofp %10 : vector<128x64xi32> to vector<128x64xf32>
    %c0_2 = arith.constant 0 : index
    %c0_3 = arith.constant 0 : index
    %12 = vector.load %arg5[%c0_2, %c0_3] : memref<128x32xf32, #tpu.memory_space<vmem>>, vector<128x32xf32>
    %c0_4 = arith.constant 0 : index
    %c0_5 = arith.constant 0 : index
    %13 = vector.load %arg3[%c0_4, %c0_5] : memref<64x32xf32, #tpu.memory_space<vmem>>, vector<64x32xf32>
    %cst = arith.constant dense<0.000000e+00> : vector<128x32xf32>
    %14 = tpu.matmul %11, %13, %cst {dimension_numbers = #tpu.dot_dimension_numbers<[1], [0], [0], [1], [0, 0, 1, 1], [], []>, precision = #tpu.contract_precision<fp32>} : vector<128x64xf32>, vector<64x32xf32>, vector<128x32xf32> -> vector<128x32xf32>
    %15 = arith.addf %12, %14 : vector<128x32xf32>
    %c0_6 = arith.constant 0 : index
    %c0_7 = arith.constant 0 : index
    %16 = vector.load %arg5[%c0_6, %c0_7] : memref<128x32xf32, #tpu.memory_space<vmem>>, vector<128x32xf32>
    tpu.vector_store %arg5[%c0_6, %c0_7], %15 {strides = array<i32>} : memref<128x32xf32, #tpu.memory_space<vmem>>, vector<128x32xf32>,
    %c0_i32_8 = arith.constant 0 : i32
    %17 = arith.cmpi eq, %arg1, %c0_i32_8 : i32
    %18 = arith.extui %17 : i1 to i32
    %c0_i32_9 = arith.constant 0 : i32
    %19 = arith.cmpi ne, %18, %c0_i32_9 : i32
    scf.if %19 {
      %c0_10 = arith.constant 0 : index
      %c0_11 = arith.constant 0 : index
      %20 = vector.load %arg5[%c0_10, %c0_11] : memref<128x32xf32, #tpu.memory_space<vmem>>, vector<128x32xf32>
      %c0_12 = arith.constant 0 : index
      %c0_13 = arith.constant 0 : index
      %21 = vector.load %arg4[%c0_12, %c0_13] : memref<128x32xf32, #tpu.memory_space<vmem>>, vector<128x32xf32>
      tpu.vector_store %arg4[%c0_12, %c0_13], %20 {strides = array<i32>} : memref<128x32xf32, #tpu.memory_space<vmem>>, vector<128x32xf32>,
    } else {
    }
    return
  }
  func.func @transform_0(%arg0: i32, %arg1: i32) -> (i32, i32) {
    %c0_i32 = arith.constant 0 : i32
    %c0_i32_0 = arith.constant 0 : i32
    return %arg0, %c0_i32 : i32, i32
  }
  func.func @transform_1(%arg0: i32, %arg1: i32) -> (i32, i32) {
    %c0_i32 = arith.constant 0 : i32
    %c0_i32_0 = arith.constant 0 : i32
    return %arg1, %c0_i32 : i32, i32
  }
  func.func @transform_2(%arg0: i32, %arg1: i32) -> (i32, i32) {
    %c0_i32 = arith.constant 0 : i32
    %c0_i32_0 = arith.constant 0 : i32
    return %arg0, %c0_i32 : i32, i32
  }
}

</mosaic_0001>

<bundles_post_ra>
// kernel: tpu_custom_call.1
= control target key start
LH: loop header
LB: loop body
LE: loop exit
PB: predicated region body
PF: predicated region fallthrough
CT: control target
= control target key end

     0   :  { %v1096_v0 = vmov 0   ;;  %vm188_vm1 = vcmask 523264   ;;  %s1749_s0 = inlined_call_operand.vmem [shape: s32[128,1], index: 0, kind: input, shape index: {}]   ;;  %s1750_s1 = inlined_call_operand.vmem [shape: f32[64,32], index: 1, kind: input, shape index: {}]   ;;  %s1751_s2 = inlined_call_operand.vmem [shape: f32[128,32], index: 2, kind: output, shape index: {}]  }
   0x1   :  { %1094 = vset.pattern.permute.xlu1 %v1096_v0  ;;  %1093 = vset.pattern.permute.xlu0 %v1096_v0  ;;  %v40_v1 = vld [vmem:[%s1749_s0 + $0x40] sm:$0xff]  ;;  %v33_v3 = vld [vmem:[%s1749_s0 + $0x8] sm:$0xff]  ;;  %v42_v5 = vld [vmem:[%s1749_s0 + $0x50] sm:$0xff] }
   0x2   :  { %v32_v2 = vld [vmem:[%s1749_s0] sm:$0xff]  ;;  %93 = vperm.xlu0 %1093, %v40_v1   ;;  %1095 = vset.pattern.permute.xlu2 %v1096_v0  ;;  %v41_v4 = vld [vmem:[%s1749_s0 + $0x48] sm:$0xff]  ;;  %v43_v6 = vld [vmem:[%s1749_s0 + $0x58] sm:$0xff]  ;;  %v66_v1 = vlaneseq }
   0x3   :  { %69 = vperm.xlu1 %1094, %v32_v2   ;;  %72 = vperm.xlu2 %1095, %v33_v3   ;;  %v34_v7 = vld [vmem:[%s1749_s0 + $0x10] sm:$0xff]  ;;  %v44_v8 = vld [vmem:[%s1749_s0 + $0x60] sm:$0xff]  ;;  %v35_v9 = vld [vmem:[%s1749_s0 + $0x18] sm:$0xff] }
   0x4   :  { %v45_v10 = vld [vmem:[%s1749_s0 + $0x68] sm:$0xff]  ;;  %v36_v11 = vld [vmem:[%s1749_s0 + $0x20] sm:$0xff]  ;;  %v46_v12 = vld [vmem:[%s1749_s0 + $0x70] sm:$0xff]  ;;  %v1249_v3 = vand.u32 127, %v66_v1 }
   0x5   :  { %v37_v13 = vld [vmem:[%s1749_s0 + $0x28] sm:$0xff]  ;;  %v47_v14 = vld [vmem:[%s1749_s0 + $0x78] sm:$0xff]  ;;  %v38_v15 = vld [vmem:[%s1749_s0 + $0x30] sm:$0xff] }
   0x6   :  { %v39_v16 = vld [vmem:[%s1749_s0 + $0x38] sm:$0xff]  ;;  %v186_v19 = vld [vmem:[%s1750_s1 + $0x30] sm:$0xff]  ;;  %v185_v22 = vld [vmem:[%s1750_s1 + $0x28] sm:$0xff] }
   0x7   :  { %v187_v17 = vld [vmem:[%s1750_s1 + $0x38] sm:$0xff]  ;;  %v1172_v21 = vand.u32 4294901760, %v186_v19  ;;  %v1183_v25 = vand.u32 4294901760, %v185_v22  ;;  %v184_v26 = vld [vmem:[%s1750_s1 + $0x20] sm:$0xff]  ;;  %v182_v37 = vld [vmem:[%s1750_s1 + $0x10] sm:$0xff] }
   0x8   :  { %v1164_v18 = vand.u32 4294901760, %v187_v17  ;;  %v1195_v30 = vand.u32 4294901760, %v184_v26  ;;  %v183_v31 = vld [vmem:[%s1750_s1 + $0x18] sm:$0xff]  ;;  %v1213_v41 = vand.u32 4294901760, %v182_v37  ;;  %v181_v43 = vld [vmem:[%s1750_s1 + $0x8] sm:$0xff]  ;;  %v180_v49 = vld [vmem:[%s1750_s1] sm:$0xff] }
   0x9   :  { %v1181_v24 = vsub.f32 %v186_v19, %v1172_v21  ;;  %v1193_v29 = vsub.f32 %v185_v22, %v1183_v25  ;;  %v1207_v36 = vand.u32 4294901760, %v183_v31  ;;  %v1222_v47 = vand.u32 4294901760, %v181_v43 }
   0xa   :  { %96 = vperm.xlu0 %1093, %v41_v4   ;;  %v1170_v20 = vsub.f32 %v187_v17, %v1164_v18  ;;  %246 = vmatpush.msra.mxu0 %v1164_v18  ;;  %v417_v35 = vsub.f32 %v184_v26, %v1195_v30  ;;  %v429_v46 = vsub.f32 %v182_v37, %v1213_v41  ;;  %v259_v53 = vand.u32 4294901760, %v180_v49 }
   0xb   :  { %99 = vperm.xlu1 %1094, %v42_v5   ;;  %102 = vperm.xlu2 %1095, %v43_v6   ;;  %v406_v28 = vand.u32 4294901760, %v1181_v24  ;;  %v412_v34 = vand.u32 4294901760, %v1193_v29  ;;  %v423_v42 = vsub.f32 %v183_v31, %v1207_v36  ;;  %v435_v52 = vsub.f32 %v181_v43, %v1222_v47 }
   0xc   :  { %1075 = vmatpush.msra.mxu2 %v1164_v18  ;;  %v400_v23 = vand.u32 4294901760, %v1170_v20  ;;  %248 = vmatpush.msra.mxu0 %v1172_v21  ;;  %v418_v40 = vand.u32 4294901760, %v417_v35  ;;  %v430_v51 = vand.u32 4294901760, %v429_v46  ;;  %v441_v57 = vsub.f32 %v180_v49, %v259_v53 }
   0xd   :  { %v407_v33 = vsub.f32 %v1181_v24, %v406_v28  ;;  %v413_v39 = vsub.f32 %v1193_v29, %v412_v34  ;;  %v424_v48 = vand.u32 4294901760, %v423_v42  ;;  %v436_v56 = vand.u32 4294901760, %v435_v52 }
   0xe   :  { %1076 = vmatpush.msra.mxu2 %v1172_v21  ;;  %v401_v27 = vsub.f32 %v1170_v20, %v400_v23  ;;  %250 = vmatpush.msra.mxu0 %v1183_v25  ;;  %v419_v45 = vsub.f32 %v417_v35, %v418_v40  ;;  %v431_v55 = vsub.f32 %v429_v46, %v430_v51  ;;  %v442_v61 = vand.u32 4294901760, %v441_v57 }
   0xf   :  { %v408_v38 = vand.u32 4294901760, %v407_v33  ;;  %v414_v44 = vand.u32 4294901760, %v413_v39  ;;  %v425_v54 = vsub.f32 %v423_v42, %v424_v48  ;;  %v437_v60 = vsub.f32 %v435_v52, %v436_v56 }
  0x10   :  { %1077 = vmatpush.msra.mxu2 %v1183_v25  ;;  %v402_v32 = vand.u32 4294901760, %v401_v27  ;;  %252 = vmatpush.msra.mxu0 %v1195_v30  ;;  %v420_v50 = vand.u32 4294901760, %v419_v45  ;;  %v432_v59 = vand.u32 4294901760, %v431_v55  ;;  %v443_v63 = vsub.f32 %v441_v57, %v442_v61 }
  0x11   :  { %v426_v58 = vand.u32 4294901760, %v425_v54  ;;  %v438_v62 = vand.u32 4294901760, %v437_v60  ;;  %v1097_v4 = vmov 0.0  }
  0x12   :  { %75 = vperm.xlu0 %1093, %v34_v7   ;;  %1078 = vmatpush.msra.mxu2 %v1195_v30  ;;  %v444_v0 = vand.u32 4294901760, %v443_v63 }
  0x13   :  { %105 = vperm.xlu1 %1094, %v44_v8   ;;  %78 = vperm.xlu2 %1095, %v35_v9  }
  0x14   :  { %403 = vmatpush.msra.mxu1 %v402_v32  ;;  %1083 = vmatpush.msra.mxu3 %v402_v32 }
  0x15   :  { %254 = vmatpush.msra.mxu0 %v1207_v36  ;;  %1079 = vmatpush.msra.mxu2 %v1207_v36 }
  0x16   :  { %409 = vmatpush.msra.mxu1 %v408_v38  ;;  %1084 = vmatpush.msra.mxu3 %v408_v38 }
  0x17   :  { %256 = vmatpush.msra.mxu0 %v1213_v41  ;;  %1080 = vmatpush.msra.mxu2 %v1213_v41 }
  0x18   :  { %415 = vmatpush.msra.mxu1 %v414_v44  ;;  %1085 = vmatpush.msra.mxu3 %v414_v44 }
  0x19   :  { %258 = vmatpush.msra.mxu0 %v1222_v47  ;;  %1081 = vmatpush.msra.mxu2 %v1222_v47 }
  0x1a   :  { %108 = vperm.xlu0 %1093, %v45_v10   ;;  %421 = vmatpush.msra.mxu1 %v420_v50 }
  0x1b   :  { %81 = vperm.xlu1 %1094, %v36_v11   ;;  %111 = vperm.xlu2 %1095, %v46_v12  }
  0x1c   :  { %1086 = vmatpush.msra.mxu3 %v420_v50  ;;  %260 = vmatpush.msra.mxu0 %v259_v53 }
  0x1d   :  { %1082 = vmatpush.msra.mxu2 %v259_v53  ;;  %427 = vmatpush.msra.mxu1 %v426_v58 }
  0x1e   :  { %756 = vmatpush.msrb.mxu0 %v400_v23  ;;  %1087 = vmatpush.msra.mxu3 %v426_v58 }
  0x1f   :  { %521 = vmatpush.msrb.mxu2 %v1170_v20  ;;  %433 = vmatpush.msra.mxu1 %v432_v59 }
  0x20   :  { %760 = vmatpush.msrb.mxu0 %v406_v28  ;;  %1088 = vmatpush.msra.mxu3 %v432_v59 }
  0x21   :  { %524 = vmatpush.msrb.mxu2 %v1181_v24  ;;  %439 = vmatpush.msra.mxu1 %v438_v62 }
  0x22   :  { %84 = vperm.xlu0 %1093, %v37_v13   ;;  %764 = vmatpush.msrb.mxu0 %v412_v34 }
  0x23   :  { %114 = vperm.xlu1 %1094, %v47_v14   ;;  %87 = vperm.xlu2 %1095, %v38_v15  }
  0x24   :  { %527 = vmatpush.msrb.mxu2 %v1193_v29  ;;  %1089 = vmatpush.msra.mxu3 %v438_v62 }
  0x25   :  { %768 = vmatpush.msrb.mxu0 %v418_v40  ;;  %445 = vmatpush.msra.mxu1 %v444_v0 }
  0x26   :  { %530 = vmatpush.msrb.mxu2 %v417_v35  ;;  %1090 = vmatpush.msra.mxu3 %v444_v0 }
  0x27   :  { %859 = vmatpush.msrb.mxu1 %v1164_v18  ;;  %772 = vmatpush.msrb.mxu0 %v424_v48 }
  0x28   :  { %633 = vmatpush.msrb.mxu3 %v1164_v18  ;;  %533 = vmatpush.msrb.mxu2 %v423_v42 }
  0x29   :  { %861 = vmatpush.msrb.mxu1 %v1172_v21  ;;  %776 = vmatpush.msrb.mxu0 %v430_v51 }
  0x2a   :  { %90 = vperm.xlu0 %1093, %v39_v16   ;;  %635 = vmatpush.msrb.mxu3 %v1172_v21 }
  0x2b   :  { %536 = vmatpush.msrb.mxu2 %v429_v46  ;;  %863 = vmatpush.msrb.mxu1 %v1183_v25 }
  0x2c   :  { %637 = vmatpush.msrb.mxu3 %v1183_v25  ;;  %780 = vmatpush.msrb.mxu0 %v436_v56 }
  0x2d   :  { %539 = vmatpush.msrb.mxu2 %v435_v52  ;;  %865 = vmatpush.msrb.mxu1 %v1195_v30 }
  0x2e   :  { %639 = vmatpush.msrb.mxu3 %v1195_v30  ;;  %784 = vmatpush.msrb.mxu0 %v442_v61 }
  0x2f   :  { %542 = vmatpush.msrb.mxu2 %v441_v57  ;;  %867 = vmatpush.msrb.mxu1 %v1207_v36 }
  0x30   :  { %641 = vmatpush.msrb.mxu3 %v1207_v36 }
  0x31   :  { %869 = vmatpush.msrb.mxu1 %v1213_v41 }
  0x32   :  { %643 = vmatpush.msrb.mxu3 %v1213_v41 }
  0x33   :  { %871 = vmatpush.msrb.mxu1 %v1222_v47 }
  0x34   :  { %645 = vmatpush.msrb.mxu3 %v1222_v47 }
  0x35   :  { %873 = vmatpush.msrb.mxu1 %v259_v53 }
  0x36   :  { %647 = vmatpush.msrb.mxu3 %v259_v53 }
  0x5d   :  { %v73_v2 = vpop.permute.xlu2 %72 }
  0x5e   :  { %vm117_vm0 = vcmp.eq.s32.totalorder %v1249_v3, %v73_v2 }
  0x5f   :  { %v1253_v5 = vsel %vm117_vm0, 1.0, %v1097_v4 }
  0x60   :  { %v193_v8 = vsel %vm188_vm1, %v1253_v5, 0 }
  0x61   :  { %v1273_v14 = vsub.f32 %v193_v8, %v193_v8 }
  0x63   :  { %v271_v23 = vand.u32 4294901760, %v1273_v14 }
  0x65   :  { %v103_v9 = vpop.permute.xlu2 %102  ;;  %v272_v32 = vsub.f32 %v1273_v14, %v271_v23 }
  0x66   :  { %vm127_vm6 = vcmp.eq.s32.totalorder %v1249_v3, %v103_v9 }
  0x67   :  { %v1315_v35 = vsel %vm127_vm6, 1.0, %v1097_v4  ;;  %v273_v39 = vand.u32 4294901760, %v272_v32 }
  0x68   :  { %v223_v41 = vsel %vm188_vm1, %v1315_v35, 0 }
  0x69   :  { %v1340_v48 = vsub.f32 %v223_v41, %v223_v41 }
  0x6b   :  { %v351_v57 = vand.u32 4294901760, %v1340_v48 }
  0x6d   :  { %v79_v30 = vpop.permute.xlu2 %78  ;;  %v352_v0 = vsub.f32 %v1340_v48, %v351_v57 }
  0x6e   :  { %vm119_vm7 = vcmp.eq.s32.totalorder %v1249_v3, %v79_v30 }
  0x6f   :  { %v1318_v36 = vsel %vm119_vm7, 1.0, %v1097_v4  ;;  %v353_v9 = vand.u32 4294901760, %v352_v0 }
  0x70   :  { %v199_v45 = vsel %vm188_vm1, %v1318_v36, 0 }
  0x71   :  { %v1343_v49 = vsub.f32 %v199_v45, %v199_v45 }
  0x73   :  { %v287_v61 = vand.u32 4294901760, %v1343_v49 }
  0x74   :  { %v94_v6 = vpop.permute.xlu0 %93 }
  0x75   :  { %v70_v7 = vpop.permute.xlu1 %69  ;;  %vm124_vm2 = vcmp.eq.s32.totalorder %v1249_v3, %v94_v6  ;;  %v112_v52 = vpop.permute.xlu2 %111  ;;  %v288_v6 = vsub.f32 %v1343_v49, %v287_v61 }
  0x76   :  { %vm116_vm3 = vcmp.eq.s32.totalorder %v1249_v3, %v70_v7  ;;  %v1260_v10 = vsel %vm124_vm2, 1.0, %v1097_v4  ;;  %vm130_vm13 = vcmp.eq.s32.totalorder %v1249_v3, %v112_v52  ;;  %vm15_vm2 = vcmask 261120  }
  0x77   :  { %v1263_v11 = vsel %vm116_vm3, 1.0, %v1097_v4  ;;  %v214_v12 = vsel %vm188_vm1, %v1260_v10, 0  ;;  %1035 = vmatmul.msk.f32.vlgmr.msra.gmra.mxu3 %vm188_vm1, %v1260_v10  ;;  %v1410_v32 = vsel %vm130_vm13, 1.0, %v1097_v4  ;;  %16 = vst.msk [vmem:[#allocation2] sm:$0xff] %vm15_vm2, %v1097_v4 }
  0x78   :  { %v190_v13 = vsel %vm188_vm1, %v1263_v11, 0  ;;  %1027 = vmatmul.msk.f32.vlgmr.msra.gmra.mxu1 %vm188_vm1, %v1263_v11  ;;  %v1275_v15 = vsub.f32 %v214_v12, %v214_v12  ;;  %17 = vst.msk [vmem:[#allocation2 + $0x8] sm:$0xff] %vm15_vm2, %v1097_v4 }
  0x79   :  { %v1277_v16 = vsub.f32 %v190_v13, %v190_v13  ;;  %18 = vst.msk [vmem:[#allocation2 + $0x10] sm:$0xff] %vm15_vm2, %v1097_v4 }
  0x7a   :  { %v327_v18 = vand.u32 4294901760, %v1275_v15  ;;  %19 = vst.msk [vmem:[#allocation2 + $0x18] sm:$0xff] %vm15_vm2, %v1097_v4 }
  0x7b   :  { %v263_v17 = vand.u32 4294901760, %v1277_v16  ;;  %20 = vst.msk [vmem:[#allocation2 + $0x20] sm:$0xff] %vm15_vm2, %v1097_v4 }
  0x7c   :  { %v97_v19 = vpop.permute.xlu0 %96  ;;  %v328_v22 = vsub.f32 %v1275_v15, %v327_v18  ;;  %21 = vst.msk [vmem:[#allocation2 + $0x28] sm:$0xff] %vm15_vm2, %v1097_v4 }
  0x7d   :  { %v100_v20 = vpop.permute.xlu1 %99  ;;  %v264_v21 = vsub.f32 %v1277_v16, %v263_v17  ;;  %vm125_vm4 = vcmp.eq.s32.totalorder %v1249_v3, %v97_v19  ;;  %v88_v12 = vpop.permute.xlu2 %87  ;;  %v289_v19 = vand.u32 4294901760, %v288_v6  ;;  %22 = vst.msk [vmem:[#allocation2 + $0x30] sm:$0xff] %vm15_vm2, %v1097_v4 }
  0x7e   :  { %vm126_vm5 = vcmp.eq.s32.totalorder %v1249_v3, %v100_v20  ;;  %v1291_v24 = vsel %vm125_vm4, 1.0, %v1097_v4  ;;  %v329_v27 = vand.u32 4294901760, %v328_v22  ;;  %vm122_vm14 = vcmp.eq.s32.totalorder %v1249_v3, %v88_v12  ;;  %23 = vst.msk [vmem:[#allocation2 + $0x38] sm:$0xff] %vm15_vm2, %v1097_v4 }
  0x7f   :  { %v1294_v25 = vsel %vm126_vm5, 1.0, %v1097_v4  ;;  %v265_v26 = vand.u32 4294901760, %v264_v21  ;;  %v217_v28 = vsel %vm188_vm1, %v1291_v24, 0  ;;  %1036 = vmatmul.msk.f32.gmra.mxu3 %vm188_vm1, %v1291_v24  ;;  %24 = vst.msk [vmem:[#allocation2 + $0x40] sm:$0xff] %vm15_vm2, %v1097_v4 }
  0x80   :  { %v220_v29 = vsel %vm188_vm1, %v1294_v25, 0  ;;  %1028 = vmatmul.msk.f32.gmra.mxu1 %vm188_vm1, %v1253_v5  ;;  %v1305_v31 = vsub.f32 %v217_v28, %v217_v28  ;;  %330 = vmatmul.f32.vlgmr.msra.gmra.mxu2 %v329_v27  ;;  %25 = vst.msk [vmem:[#allocation2 + $0x48] sm:$0xff] %vm15_vm2, %v1097_v4 }
  0x81   :  { %266 = vmatmul.f32.vlgmr.msra.gmra.mxu0 %v265_v26  ;;  %v1311_v33 = vsub.f32 %v220_v29, %v220_v29  ;;  %26 = vst.msk [vmem:[#allocation2 + $0x50] sm:$0xff] %vm15_vm2, %v1097_v4 }
  0x82   :  { %v335_v34 = vand.u32 4294901760, %v1305_v31  ;;  %27 = vst.msk [vmem:[#allocation2 + $0x58] sm:$0xff] %vm15_vm2, %v1097_v4 }
  0x83   :  { %v343_v44 = vand.u32 4294901760, %v1311_v33  ;;  %28 = vst.msk [vmem:[#allocation2 + $0x60] sm:$0xff] %vm15_vm2, %v1097_v4 }
  0x84   :  { %v76_v37 = vpop.permute.xlu0 %75  ;;  %v336_v40 = vsub.f32 %v1305_v31, %v335_v34  ;;  %29 = vst.msk [vmem:[#allocation2 + $0x68] sm:$0xff] %vm15_vm2, %v1097_v4 }
  0x85   :  { %v106_v38 = vpop.permute.xlu1 %105  ;;  %vm118_vm8 = vcmp.eq.s32.totalorder %v1249_v3, %v76_v37  ;;  %v344_v51 = vsub.f32 %v1311_v33, %v343_v44  ;;  %v1413_v37 = vsel %vm122_vm14, 1.0, %v1097_v4  ;;  %30 = vst.msk [vmem:[#allocation2 + $0x70] sm:$0xff] %vm15_vm2, %v1097_v4 }
  0x86   :  { %v1327_v42 = vsel %vm118_vm8, 1.0, %v1097_v4  ;;  %v337_v43 = vand.u32 4294901760, %v336_v40  ;;  %vm128_vm9 = vcmp.eq.s32.totalorder %v1249_v3, %v106_v38  ;;  %31 = vst.msk [vmem:[#allocation2 + $0x78] sm:$0xff] %vm15_vm2, %v1097_v4 }
  0x87   :  { %v196_v46 = vsel %vm188_vm1, %v1327_v42, 0  ;;  %1037 = vmatmul.msk.f32.gmra.mxu3 %vm188_vm1, %v1294_v25  ;;  %v1350_v53 = vsel %vm128_vm9, 1.0, %v1097_v4  ;;  %v345_v60 = vand.u32 4294901760, %v344_v51  ;;  %v208_v51 = vsel %vm188_vm1, %v1413_v37, 0 }
  0x88   :  { %1029 = vmatmul.msk.f32.gmra.mxu1 %vm188_vm1, %v1327_v42  ;;  %v1338_v47 = vsub.f32 %v196_v46, %v196_v46  ;;  %338 = vmatmul.f32.gmra.mxu2 %v337_v43  ;;  %v226_v62 = vsel %vm188_vm1, %v1350_v53, 0  ;;  %v232_v46 = vsel %vm188_vm1, %v1410_v32, 0 }
  0x89   :  { %274 = vmatmul.f32.gmra.mxu0 %v273_v39  ;;  %v1373_v1 = vsub.f32 %v226_v62, %v226_v62  ;;  %v1427_v52 = vsub.f32 %v232_v46, %v232_v46 }
  0x8a   :  { %v279_v50 = vand.u32 4294901760, %v1338_v47 }
  0x8b   :  { %v359_v21 = vand.u32 4294901760, %v1373_v1 }
  0x8c   :  { %v109_v54 = vpop.permute.xlu0 %108  ;;  %v280_v56 = vsub.f32 %v1338_v47, %v279_v50 }
  0x8d   :  { %v82_v55 = vpop.permute.xlu1 %81  ;;  %vm129_vm11 = vcmp.eq.s32.totalorder %v1249_v3, %v109_v54  ;;  %v360_v30 = vsub.f32 %v1373_v1, %v359_v21  ;;  %v310_v54 = vsub.f32 %v208_v51, %v208_v51 }
  0x8e   :  { %vm120_vm10 = vcmp.eq.s32.totalorder %v1249_v3, %v82_v55  ;;  %v281_v59 = vand.u32 4294901760, %v280_v56  ;;  %v1381_v7 = vsel %vm129_vm11, 1.0, %v1097_v4 }
  0x8f   :  { %v1358_v58 = vsel %vm120_vm10, 1.0, %v1097_v4  ;;  %1038 = vmatmul.msk.f32.gmra.mxu3 %vm188_vm1, %v1315_v35  ;;  %v229_v22 = vsel %vm188_vm1, %v1381_v7, 0  ;;  %v361_v41 = vand.u32 4294901760, %v360_v30  ;;  %v311_v0 = vand.u32 4294901760, %v310_v54 }
  0x90   :  { %v202_v63 = vsel %vm188_vm1, %v1358_v58, 0  ;;  %1030 = vmatmul.msk.f32.gmra.mxu1 %vm188_vm1, %v1318_v36  ;;  %346 = vmatmul.f32.gmra.mxu2 %v345_v60  ;;  %v1399_v27 = vsub.f32 %v229_v22, %v229_v22 }
  0x91   :  { %282 = vmatmul.f32.gmra.mxu0 %v281_v59  ;;  %v1375_v2 = vsub.f32 %v202_v63, %v202_v63 }
  0x92   :  { %v367_v45 = vand.u32 4294901760, %v1399_v27 }
  0x93   :  { %v295_v20 = vand.u32 4294901760, %v1375_v2 }
  0x94   :  { %v85_v8 = vpop.permute.xlu0 %84  ;;  %v368_v56 = vsub.f32 %v1399_v27, %v367_v45 }
  0x95   :  { %vm121_vm12 = vcmp.eq.s32.totalorder %v1249_v3, %v85_v8  ;;  %v296_v29 = vsub.f32 %v1375_v2, %v295_v20  ;;  %v115_v38 = vpop.permute.xlu1 %114 }
  0x96   :  { %v1385_v13 = vsel %vm121_vm12, 1.0, %v1097_v4  ;;  %vm131_vm15 = vcmp.eq.s32.totalorder %v1249_v3, %v115_v38  ;;  %v369_v63 = vand.u32 4294901760, %v368_v56 }
  0x97   :  { %v205_v26 = vsel %vm188_vm1, %v1385_v13, 0  ;;  %1039 = vmatmul.msk.f32.gmra.mxu3 %vm188_vm1, %v1350_v53  ;;  %v297_v40 = vand.u32 4294901760, %v296_v29  ;;  %v1434_v59 = vsel %vm131_vm15, 1.0, %v1097_v4 }
  0x98   :  { %1031 = vmatmul.msk.f32.gmra.mxu1 %vm188_vm1, %v1358_v58  ;;  %354 = vmatmul.f32.gmra.mxu2 %v353_v9  ;;  %v1401_v28 = vsub.f32 %v205_v26, %v205_v26  ;;  %v235_v6 = vsel %vm188_vm1, %v1434_v59, 0 }
  0x99   :  { %290 = vmatmul.f32.gmra.mxu0 %v289_v19  ;;  %v1448_v9 = vsub.f32 %v235_v6, %v235_v6  ;;  %v312_v19 = vsub.f32 %v310_v54, %v311_v0 }
  0x9a   :  { %v303_v43 = vand.u32 4294901760, %v1401_v28 }
  0x9b   :  { %v313_v26 = vand.u32 4294901760, %v312_v19  ;;  %v383_v38 = vand.u32 4294901760, %v1448_v9 }
  0x9c   :  { %v91_v39 = vpop.permute.xlu0 %90  ;;  %v304_v55 = vsub.f32 %v1401_v28, %v303_v43 }
  0x9d   :  { %vm123_vm0 = vcmp.eq.s32.totalorder %v1249_v3, %v91_v39  ;;  %v375_v3 = vand.u32 4294901760, %v1427_v52 }
  0x9e   :  { %v1437_v60 = vsel %vm123_vm0, 1.0, %v1097_v4  ;;  %v305_v62 = vand.u32 4294901760, %v304_v55 }
  0x9f   :  { %1040 = vmatmul.msk.f32.gmra.mxu3 %vm188_vm1, %v1381_v7  ;;  %v211_v8 = vsel %vm188_vm1, %v1437_v60, 0  ;;  %v376_v22 = vsub.f32 %v1427_v52, %v375_v3 }
  0xa0   :  { %1032 = vmatmul.msk.f32.gmra.mxu1 %vm188_vm1, %v1385_v13  ;;  %362 = vmatmul.f32.gmra.mxu2 %v361_v41  ;;  %v318_v12 = vsub.f32 %v211_v8, %v211_v8 }
  0xa1   :  { %298 = vmatmul.f32.gmra.mxu0 %v297_v40  ;;  %v377_v29 = vand.u32 4294901760, %v376_v22  ;;  %v384_v40 = vsub.f32 %v1448_v9, %v383_v38 }
  0xa2   :  { %v319_v30 = vand.u32 4294901760, %v318_v12 }
  0xa3   :  { %v385_v46 = vand.u32 4294901760, %v384_v40 }
  0xa4   :  { %v320_v39 = vsub.f32 %v318_v12, %v319_v30 }
  0xa6   :  { %v321_v41 = vand.u32 4294901760, %v320_v39 }
  0xa7   :  { %1041 = vmatmul.msk.f32.gmra.mxu3 %vm188_vm1, %v1410_v32 }
  0xa8   :  { %1033 = vmatmul.msk.f32.gmra.mxu1 %vm188_vm1, %v1413_v37  ;;  %370 = vmatmul.f32.gmra.mxu2 %v369_v63 }
  0xa9   :  { %306 = vmatmul.f32.gmra.mxu0 %v305_v62 }
  0xaf   :  { %1042 = vmatmul.msk.f32.gmra.mxu3 %vm188_vm1, %v1434_v59 }
  0xb0   :  { %1034 = vmatmul.msk.f32.gmra.mxu1 %vm188_vm1, %v1437_v60  ;;  %378 = vmatmul.f32.gmra.mxu2 %v377_v29 }
  0xb1   :  { %314 = vmatmul.f32.gmra.mxu0 %v313_v26 }
  0xb7   :  { %651 = vmatmul.f32.vlgmr.msrb.gmra.mxu3 %v263_v17 }
  0xb8   :  { %1059 = vmatmul.msk.f32.vlgmr.msrb.gmra.mxu1 %vm188_vm1, %v1263_v11  ;;  %386 = vmatmul.f32.gmra.mxu2 %v385_v46  ;;  %v165_v46 = vld [vmem:[#allocation2 + $0x8] sm:$0xff] }
  0xb9   :  { %322 = vmatmul.f32.gmra.mxu0 %v321_v41 }
  0xbf   :  { %657 = vmatmul.f32.gmra.mxu3 %v271_v23 }
  0xc0   :  { %1060 = vmatmul.msk.f32.gmra.mxu1 %vm188_vm1, %v1253_v5  ;;  %545 = vmatmul.f32.vlgmr.msrb.gmra.mxu2 %v1277_v16 }
  0xc1   :  { %1043 = vmatmul.msk.f32.vlgmr.msrb.gmra.mxu0 %vm188_vm1, %v1263_v11 }
  0xc7   :  { %663 = vmatmul.f32.gmra.mxu3 %v279_v50 }
  0xc8   :  { %1061 = vmatmul.msk.f32.gmra.mxu1 %vm188_vm1, %v1327_v42  ;;  %550 = vmatmul.f32.gmra.mxu2 %v1273_v14 }
  0xc9   :  { %1044 = vmatmul.msk.f32.gmra.mxu0 %vm188_vm1, %v1253_v5 }
  0xcf   :  { %669 = vmatmul.f32.gmra.mxu3 %v287_v61 }
  0xd0   :  { %1062 = vmatmul.msk.f32.gmra.mxu1 %vm188_vm1, %v1318_v36  ;;  %555 = vmatmul.f32.gmra.mxu2 %v1338_v47 }
  0xd1   :  { %1045 = vmatmul.msk.f32.gmra.mxu0 %vm188_vm1, %v1327_v42 }
  0xd7   :  { %675 = vmatmul.f32.gmra.mxu3 %v295_v20 }
  0xd8   :  { %1063 = vmatmul.msk.f32.gmra.mxu1 %vm188_vm1, %v1358_v58  ;;  %560 = vmatmul.f32.gmra.mxu2 %v1343_v49 }
  0xd9   :  { %1046 = vmatmul.msk.f32.gmra.mxu0 %vm188_vm1, %v1318_v36 }
  0xdf   :  { %681 = vmatmul.f32.gmra.mxu3 %v303_v43 }
  0xe0   :  { %1064 = vmatmul.msk.f32.gmra.mxu1 %vm188_vm1, %v1385_v13  ;;  %565 = vmatmul.f32.gmra.mxu2 %v1375_v2 }
  0xe1   :  { %1047 = vmatmul.msk.f32.gmra.mxu0 %vm188_vm1, %v1358_v58 }
  0xe7   :  { %687 = vmatmul.f32.gmra.mxu3 %v311_v0 }
  0xe8   :  { %1065 = vmatmul.msk.f32.gmra.mxu1 %vm188_vm1, %v1413_v37  ;;  %570 = vmatmul.f32.gmra.mxu2 %v1401_v28 }
  0xe9   :  { %1048 = vmatmul.msk.f32.gmra.mxu0 %vm188_vm1, %v1385_v13 }
  0xef   :  { %693 = vmatmul.f32.gmra.mxu3 %v319_v30 }
  0xf0   :  { %1066 = vmatmul.msk.f32.gmra.mxu1 %vm188_vm1, %v1437_v60  ;;  %575 = vmatmul.f32.gmra.mxu2 %v310_v54 }
  0xf1   :  { %1049 = vmatmul.msk.f32.gmra.mxu0 %vm188_vm1, %v1413_v37 }
  0xf5   :  { %v1507_v5 = vpop.f32.mrf.mxu1 }
  0xf7   :  { %699 = vmatmul.f32.gmra.mxu3 %v327_v18 }
  0xf8   :  { %1067 = vmatmul.msk.f32.gmra.mxu1 %vm188_vm1, %v1260_v10  ;;  %580 = vmatmul.f32.gmra.mxu2 %v318_v12 }
  0xf9   :  { %1050 = vmatmul.msk.f32.gmra.mxu0 %vm188_vm1, %v1437_v60 }
  0xfa   :  { %v480_v11 = vpop.f32.mrf.mxu3 }
  0xfd   :  { %v1515_v14 = vpop.f32.mrf.mxu1 }
  0xfe   :  { %v1517_v16 = vpop.f32.mrf.mxu0 }
  0xff   :  { %705 = vmatmul.f32.gmra.mxu3 %v335_v34  ;;  %v449_v4 = vadd.f32 %v1507_v5, %v1517_v16 }
 0x100   :  { %1068 = vmatmul.msk.f32.gmra.mxu1 %vm188_vm1, %v1291_v24  ;;  %585 = vmatmul.f32.gmra.mxu2 %v1275_v15 }
 0x101   :  { %1051 = vmatmul.msk.f32.gmra.mxu0 %vm188_vm1, %v1260_v10 }
 0x102   :  { %v484_v17 = vpop.f32.mrf.mxu3 }
 0x103   :  { %v331_v18 = vpop.f32.mrf.mxu2 }
 0x104   :  { %v1526_v23 = vadd.f32 %v480_v11, %v331_v18 }
 0x105   :  { %v1528_v36 = vpop.f32.mrf.mxu1 }
 0x106   :  { %v1530_v42 = vpop.f32.mrf.mxu0 }
 0x107   :  { %711 = vmatmul.f32.gmra.mxu3 %v343_v44 }
 0x108   :  { %1069 = vmatmul.msk.f32.gmra.mxu1 %vm188_vm1, %v1294_v25  ;;  %590 = vmatmul.f32.gmra.mxu2 %v1305_v31 }
 0x109   :  { %1052 = vmatmul.msk.f32.gmra.mxu0 %vm188_vm1, %v1291_v24 }
 0x10a   :  { %v488_v10 = vpop.f32.mrf.mxu3 }
 0x10b   :  { %v339_v15 = vpop.f32.mrf.mxu2 }
 0x10c   :  { %v1539_v34 = vadd.f32 %v484_v17, %v339_v15 }
 0x10d   :  { %v1541_v47 = vpop.f32.mrf.mxu1 }
 0x10e   :  { %v1543_v49 = vpop.f32.mrf.mxu0 }
 0x10f   :  { %717 = vmatmul.f32.gmra.mxu3 %v351_v57  ;;  %v457_v5 = vadd.f32 %v1528_v36, %v1543_v49 }
 0x110   :  { %1070 = vmatmul.msk.f32.gmra.mxu1 %vm188_vm1, %v1315_v35  ;;  %595 = vmatmul.f32.gmra.mxu2 %v1311_v33 }
 0x111   :  { %1053 = vmatmul.msk.f32.gmra.mxu0 %vm188_vm1, %v1294_v25 }
 0x112   :  { %v492_v24 = vpop.f32.mrf.mxu3 }
 0x113   :  { %v347_v31 = vpop.f32.mrf.mxu2 }
 0x114   :  { %v1552_v44 = vadd.f32 %v488_v10, %v347_v31 }
 0x115   :  { %v1554_v50 = vpop.f32.mrf.mxu1 }
 0x116   :  { %v1556_v58 = vpop.f32.mrf.mxu0 }
 0x117   :  { %723 = vmatmul.f32.gmra.mxu3 %v359_v21  ;;  %v461_v36 = vadd.f32 %v1541_v47, %v1556_v58 }
 0x118   :  { %1071 = vmatmul.msk.f32.gmra.mxu1 %vm188_vm1, %v1350_v53  ;;  %600 = vmatmul.f32.gmra.mxu2 %v1340_v48 }
 0x119   :  { %1054 = vmatmul.msk.f32.gmra.mxu0 %vm188_vm1, %v1315_v35 }
 0x11a   :  { %v496_v25 = vpop.f32.mrf.mxu3 }
 0x11b   :  { %v355_v33 = vpop.f32.mrf.mxu2 }
 0x11c   :  { %v1565_v57 = vadd.f32 %v492_v24, %v355_v33 }
 0x11d   :  { %v1567_v61 = vpop.f32.mrf.mxu1 }
 0x11e   :  { %v1569_v2 = vpop.f32.mrf.mxu0 }
 0x11f   :  { %729 = vmatmul.f32.gmra.mxu3 %v367_v45  ;;  %v465_v47 = vadd.f32 %v1554_v50, %v1569_v2 }
 0x120   :  { %1072 = vmatmul.msk.f32.gmra.mxu1 %vm188_vm1, %v1381_v7  ;;  %605 = vmatmul.f32.gmra.mxu2 %v1373_v1 }
 0x121   :  { %1055 = vmatmul.msk.f32.gmra.mxu0 %vm188_vm1, %v1350_v53 }
 0x122   :  { %v500_v35 = vpop.f32.mrf.mxu3 }
 0x123   :  { %v363_v48 = vpop.f32.mrf.mxu2 }
 0x124   :  { %v1580_v13 = vadd.f32 %v496_v25, %v363_v48  ;;  %v166_v25 = vld [vmem:[#allocation2 + $0x10] sm:$0xff] }
 0x125   :  { %v1582_v20 = vpop.f32.mrf.mxu1 }
 0x126   :  { %v1586_v21 = vpop.f32.mrf.mxu0 }
 0x127   :  { %735 = vmatmul.f32.gmra.mxu3 %v375_v3  ;;  %v469_v50 = vadd.f32 %v1567_v61, %v1586_v21 }
 0x128   :  { %1073 = vmatmul.msk.f32.gmra.mxu1 %vm188_vm1, %v1410_v32  ;;  %610 = vmatmul.f32.gmra.mxu2 %v1399_v27 }
 0x129   :  { %1056 = vmatmul.msk.f32.gmra.mxu0 %vm188_vm1, %v1381_v7 }
 0x12a   :  { %v504_v53 = vpop.f32.mrf.mxu3 }
 0x12b   :  { %v371_v1 = vpop.f32.mrf.mxu2 }
 0x12c   :  { %v1609_v28 = vadd.f32 %v500_v35, %v371_v1 }
 0x12d   :  { %v1611_v27 = vpop.f32.mrf.mxu1 }
 0x12e   :  { %v1615_v7 = vpop.f32.mrf.mxu0 }
 0x12f   :  { %741 = vmatmul.f32.gmra.mxu3 %v383_v38  ;;  %v473_v61 = vadd.f32 %v1582_v20, %v1615_v7 }
 0x130   :  { %1074 = vmatmul.msk.f32.gmra.mxu1 %vm188_vm1, %v1434_v59  ;;  %615 = vmatmul.f32.gmra.mxu2 %v1427_v52 }
 0x131   :  { %1057 = vmatmul.msk.f32.gmra.mxu0 %vm188_vm1, %v1410_v32 }
 0x132   :  { %v508_v37 = vpop.f32.mrf.mxu3 }
 0x133   :  { %v379_v43 = vpop.f32.mrf.mxu2 }
 0x134   :  { %v1636_v45 = vadd.f32 %v504_v53, %v379_v43 }
 0x135   :  { %v876_v51 = vpop.f32.mrf.mxu1 }
 0x136   :  { %v1638_v54 = vpop.f32.mrf.mxu0 }
 0x137   :  { %v477_v20 = vadd.f32 %v1611_v27, %v1638_v54 }
 0x138   :  { %620 = vmatmul.f32.gmra.mxu2 %v1448_v9  ;;  %v164_v9 = vld [vmem:[#allocation2] sm:$0xff] }
 0x139   :  { %1058 = vmatmul.msk.f32.gmra.mxu0 %vm188_vm1, %v1434_v59  ;;  %v453_v59 = vadd.f32 %v1515_v14, %v1530_v42 }
 0x13a   :  { %v652_v32 = vpop.f32.mrf.mxu3 }
 0x13b   :  { %v387_v52 = vpop.f32.mrf.mxu2 }
 0x13c   :  { %v1643_v55 = vadd.f32 %v508_v37, %v387_v52  ;;  %v167_v52 = vld [vmem:[#allocation2 + $0x18] sm:$0xff] }
 0x13d   :  { %v880_v56 = vpop.f32.mrf.mxu1 }
 0x13e   :  { %v787_v60 = vpop.f32.mrf.mxu0 }
 0x142   :  { %v658_v62 = vpop.f32.mrf.mxu3 }
 0x143   :  { %v546_v63 = vpop.f32.mrf.mxu2 }
 0x144   :  { %v547_v0 = vadd.f32 %v546_v63, %v449_v4 }
 0x145   :  { %v884_v3 = vpop.f32.mrf.mxu1 }
 0x146   :  { %v791_v6 = vpop.f32.mrf.mxu0  ;;  %v653_v8 = vadd.f32 %v652_v32, %v547_v0 }
 0x148   :  { %v788_v12 = vadd.f32 %v787_v60, %v653_v8 }
 0x14a   :  { %v877_v19 = vadd.f32 %v876_v51, %v788_v12  ;;  %v664_v22 = vpop.f32.mrf.mxu3  ;;  %v168_v12 = vld [vmem:[#allocation2 + $0x20] sm:$0xff] }
 0x14b   :  { %v551_v26 = vpop.f32.mrf.mxu2 }
 0x14c   :  { %v939_v29 = vadd.f32 %v877_v19, %v164_v9  ;;  %v552_v30 = vadd.f32 %v551_v26, %v453_v59 }
 0x14d   :  { %v888_v38 = vpop.f32.mrf.mxu1 }
 0x14e   :  { %v795_v39 = vpop.f32.mrf.mxu0  ;;  %956 = vst.msk [vmem:[#allocation2] sm:$0xff] %vm15_vm2, %v939_v29  ;;  %v659_v40 = vadd.f32 %v658_v62, %v552_v30 }
 0x150   :  { %v792_v41 = vadd.f32 %v791_v6, %v659_v40 }
 0x152   :  { %v881_v11 = vadd.f32 %v880_v56, %v792_v41  ;;  %v670_v16 = vpop.f32.mrf.mxu3 }
 0x153   :  { %v556_v17 = vpop.f32.mrf.mxu2 }
 0x154   :  { %v940_v18 = vadd.f32 %v881_v11, %v165_v46  ;;  %v557_v14 = vadd.f32 %v556_v17, %v457_v5 }
 0x155   :  { %v892_v42 = vpop.f32.mrf.mxu1  ;;  %v975_v10 = vld [vmem:[#allocation2] sm:$0xff] }
 0x156   :  { %v799_v15 = vpop.f32.mrf.mxu0  ;;  %991 = vst.msk [vmem:[%s1751_s2] sm:$0xff] %vm15_vm2, %v975_v10  ;;  %v665_v24 = vadd.f32 %v664_v22, %v557_v14 }
 0x157   :  { %957 = vst.msk [vmem:[#allocation2 + $0x8] sm:$0xff] %vm15_vm2, %v940_v18 }
 0x158   :  { %v796_v31 = vadd.f32 %v795_v39, %v665_v24  ;;  %v169_v39 = vld [vmem:[#allocation2 + $0x28] sm:$0xff] }
 0x15a   :  { %v885_v49 = vadd.f32 %v884_v3, %v796_v31  ;;  %v676_v33 = vpop.f32.mrf.mxu3 }
 0x15b   :  { %v561_v35 = vpop.f32.mrf.mxu2 }
 0x15c   :  { %v941_v48 = vadd.f32 %v885_v49, %v166_v25  ;;  %v562_v53 = vadd.f32 %v561_v35, %v461_v36 }
 0x15d   :  { %v896_v1 = vpop.f32.mrf.mxu1 }
 0x15e   :  { %v803_v37 = vpop.f32.mrf.mxu0  ;;  %v976_v43 = vld [vmem:[#allocation2 + $0x8] sm:$0xff]  ;;  %958 = vst.msk [vmem:[#allocation2 + $0x10] sm:$0xff] %vm15_vm2, %v941_v48  ;;  %v671_v51 = vadd.f32 %v670_v16, %v562_v53  ;;  %v171_v48 = vld [vmem:[#allocation2 + $0x38] sm:$0xff] }
 0x15f   :  { %992 = vst.msk [vmem:[%s1751_s2 + $0x8] sm:$0xff] %vm15_vm2, %v976_v43 }
 0x160   :  { %v800_v32 = vadd.f32 %v799_v15, %v671_v51 }
 0x162   :  { %v889_v58 = vadd.f32 %v888_v38, %v800_v32  ;;  %v682_v56 = vpop.f32.mrf.mxu3 }
 0x163   :  { %v566_v60 = vpop.f32.mrf.mxu2 }
 0x164   :  { %v942_v4 = vadd.f32 %v889_v58, %v167_v52  ;;  %v567_v62 = vadd.f32 %v566_v60, %v465_v47  ;;  %v172_v58 = vld [vmem:[#allocation2 + $0x40] sm:$0xff] }
 0x165   :  { %v977_v63 = vld [vmem:[#allocation2 + $0x10] sm:$0xff]  ;;  %v900_v6 = vpop.f32.mrf.mxu1 }
 0x166   :  { %v807_v0 = vpop.f32.mrf.mxu0  ;;  %993 = vst.msk [vmem:[%s1751_s2 + $0x10] sm:$0xff] %vm15_vm2, %v977_v63  ;;  %v677_v3 = vadd.f32 %v676_v33, %v567_v62 }
 0x167   :  { %959 = vst.msk [vmem:[#allocation2 + $0x18] sm:$0xff] %vm15_vm2, %v942_v4 }
 0x168   :  { %v804_v8 = vadd.f32 %v803_v37, %v677_v3 }
 0x16a   :  { %v893_v2 = vadd.f32 %v892_v42, %v804_v8  ;;  %v688_v9 = vpop.f32.mrf.mxu3  ;;  %v170_v42 = vld [vmem:[#allocation2 + $0x30] sm:$0xff] }
 0x16b   :  { %v571_v59 = vpop.f32.mrf.mxu2 }
 0x16c   :  { %v943_v19 = vadd.f32 %v893_v2, %v168_v12  ;;  %v572_v22 = vadd.f32 %v571_v59, %v469_v50  ;;  %v173_v12 = vld [vmem:[#allocation2 + $0x48] sm:$0xff] }
 0x16d   :  { %v904_v40 = vpop.f32.mrf.mxu1 }
 0x16e   :  { %v811_v26 = vpop.f32.mrf.mxu0  ;;  %v978_v29 = vld [vmem:[#allocation2 + $0x18] sm:$0xff]  ;;  %960 = vst.msk [vmem:[#allocation2 + $0x20] sm:$0xff] %vm15_vm2, %v943_v19  ;;  %v683_v30 = vadd.f32 %v682_v56, %v572_v22 }
 0x16f   :  { %994 = vst.msk [vmem:[%s1751_s2 + $0x18] sm:$0xff] %vm15_vm2, %v978_v29 }
 0x170   :  { %v808_v38 = vadd.f32 %v807_v0, %v683_v30 }
 0x172   :  { %v897_v21 = vadd.f32 %v896_v1, %v808_v38  ;;  %v694_v41 = vpop.f32.mrf.mxu3  ;;  %v174_v38 = vld [vmem:[#allocation2 + $0x50] sm:$0xff] }
 0x173   :  { %v576_v46 = vpop.f32.mrf.mxu2 }
 0x174   :  { %v944_v5 = vadd.f32 %v897_v21, %v169_v39  ;;  %v577_v11 = vadd.f32 %v576_v46, %v473_v61 }
 0x175   :  { %v979_v16 = vld [vmem:[#allocation2 + $0x20] sm:$0xff]  ;;  %v908_v15 = vpop.f32.mrf.mxu1 }
 0x176   :  { %v815_v17 = vpop.f32.mrf.mxu0  ;;  %995 = vst.msk [vmem:[%s1751_s2 + $0x20] sm:$0xff] %vm15_vm2, %v979_v16  ;;  %v689_v18 = vadd.f32 %v688_v9, %v577_v11  ;;  %v175_v11 = vld [vmem:[#allocation2 + $0x58] sm:$0xff] }
 0x177   :  { %961 = vst.msk [vmem:[#allocation2 + $0x28] sm:$0xff] %vm15_vm2, %v944_v5 }
 0x178   :  { %v812_v14 = vadd.f32 %v811_v26, %v689_v18 }
 0x17a   :  { %v901_v7 = vadd.f32 %v900_v6, %v812_v14  ;;  %v700_v10 = vpop.f32.mrf.mxu3 }
 0x17b   :  { %v581_v24 = vpop.f32.mrf.mxu2 }
 0x17c   :  { %v945_v31 = vadd.f32 %v901_v7, %v170_v42  ;;  %v582_v25 = vadd.f32 %v581_v24, %v477_v20  ;;  %v176_v24 = vld [vmem:[#allocation2 + $0x60] sm:$0xff] }
 0x17d   :  { %v912_v51 = vpop.f32.mrf.mxu1 }
 0x17e   :  { %v819_v36 = vpop.f32.mrf.mxu0  ;;  %v980_v49 = vld [vmem:[#allocation2 + $0x28] sm:$0xff]  ;;  %962 = vst.msk [vmem:[#allocation2 + $0x30] sm:$0xff] %vm15_vm2, %v945_v31  ;;  %v695_v33 = vadd.f32 %v694_v41, %v582_v25 }
 0x17f   :  { %996 = vst.msk [vmem:[%s1751_s2 + $0x28] sm:$0xff] %vm15_vm2, %v980_v49 }
 0x180   :  { %v816_v35 = vadd.f32 %v815_v17, %v695_v33 }
 0x182   :  { %v905_v53 = vadd.f32 %v904_v40, %v816_v35  ;;  %v706_v27 = vpop.f32.mrf.mxu3 }
 0x183   :  { %v586_v54 = vpop.f32.mrf.mxu2 }
 0x184   :  { %v946_v1 = vadd.f32 %v905_v53, %v171_v48  ;;  %v587_v37 = vadd.f32 %v586_v54, %v1526_v23 }
 0x185   :  { %v981_v43 = vld [vmem:[#allocation2 + $0x30] sm:$0xff]  ;;  %v916_v6 = vpop.f32.mrf.mxu1 }
 0x186   :  { %v823_v32 = vpop.f32.mrf.mxu0  ;;  %997 = vst.msk [vmem:[%s1751_s2 + $0x30] sm:$0xff] %vm15_vm2, %v981_v43  ;;  %v701_v52 = vadd.f32 %v700_v10, %v587_v37 }
 0x187   :  { %963 = vst.msk [vmem:[#allocation2 + $0x38] sm:$0xff] %vm15_vm2, %v946_v1 }
 0x188   :  { %v820_v47 = vadd.f32 %v819_v36, %v701_v52 }
 0x18a   :  { %v909_v56 = vadd.f32 %v908_v15, %v820_v47  ;;  %v712_v60 = vpop.f32.mrf.mxu3 }
 0x18b   :  { %v591_v4 = vpop.f32.mrf.mxu2 }
 0x18c   :  { %v947_v62 = vadd.f32 %v909_v56, %v172_v58  ;;  %v592_v63 = vadd.f32 %v591_v4, %v1539_v34  ;;  %v178_v56 = vld [vmem:[#allocation2 + $0x70] sm:$0xff] }
 0x18d   :  { %v920_v30 = vpop.f32.mrf.mxu1 }
 0x18e   :  { %v827_v23 = vpop.f32.mrf.mxu0  ;;  %v982_v0 = vld [vmem:[#allocation2 + $0x38] sm:$0xff]  ;;  %964 = vst.msk [vmem:[#allocation2 + $0x40] sm:$0xff] %vm15_vm2, %v947_v62  ;;  %v707_v3 = vadd.f32 %v706_v27, %v592_v63  ;;  %v177_v27 = vld [vmem:[#allocation2 + $0x68] sm:$0xff] }
 0x18f   :  { %998 = vst.msk [vmem:[%s1751_s2 + $0x38] sm:$0xff] %vm15_vm2, %v982_v0 }
 0x190   :  { %v824_v8 = vadd.f32 %v823_v32, %v707_v3 }
 0x192   :  { %v913_v50 = vadd.f32 %v912_v51, %v824_v8  ;;  %v718_v34 = vpop.f32.mrf.mxu3 }
 0x193   :  { %v596_v2 = vpop.f32.mrf.mxu2 }
 0x194   :  { %v948_v9 = vadd.f32 %v913_v50, %v173_v12  ;;  %v597_v59 = vadd.f32 %v596_v2, %v1552_v44  ;;  %v179_v12 = vld [vmem:[#allocation2 + $0x78] sm:$0xff] }
 0x195   :  { %v983_v19 = vld [vmem:[#allocation2 + $0x40] sm:$0xff]  ;;  %v924_v18 = vpop.f32.mrf.mxu1 }
 0x196   :  { %999 = vst.msk [vmem:[%s1751_s2 + $0x40] sm:$0xff] %vm15_vm2, %v983_v19  ;;  %v713_v22 = vadd.f32 %v712_v60, %v597_v59  ;;  %v831_v26 = vpop.f32.mrf.mxu0 }
 0x197   :  { %965 = vst.msk [vmem:[#allocation2 + $0x48] sm:$0xff] %vm15_vm2, %v948_v9 }
 0x198   :  { %v828_v29 = vadd.f32 %v827_v23, %v713_v22 }
 0x19a   :  { %v917_v39 = vadd.f32 %v916_v6, %v828_v29  ;;  %v724_v46 = vpop.f32.mrf.mxu3 }
 0x19b   :  { %v601_v40 = vpop.f32.mrf.mxu2 }
 0x19c   :  { %v949_v61 = vadd.f32 %v917_v39, %v174_v38  ;;  %v602_v21 = vadd.f32 %v601_v40, %v1565_v57 }
 0x19d   :  { %v928_v35 = vpop.f32.mrf.mxu1 }
 0x19e   :  { %v984_v44 = vld [vmem:[#allocation2 + $0x48] sm:$0xff]  ;;  %966 = vst.msk [vmem:[#allocation2 + $0x50] sm:$0xff] %vm15_vm2, %v949_v61  ;;  %v719_v41 = vadd.f32 %v718_v34, %v602_v21  ;;  %v835_v16 = vpop.f32.mrf.mxu0 }
 0x19f   :  { %1000 = vst.msk [vmem:[%s1751_s2 + $0x48] sm:$0xff] %vm15_vm2, %v984_v44 }
 0x1a0   :  { %v832_v5 = vadd.f32 %v831_v26, %v719_v41 }
 0x1a2   :  { %v921_v17 = vadd.f32 %v920_v30, %v832_v5  ;;  %v730_v15 = vpop.f32.mrf.mxu3 }
 0x1a3   :  { %v606_v14 = vpop.f32.mrf.mxu2 }
 0x1a4   :  { %v950_v42 = vadd.f32 %v921_v17, %v175_v11  ;;  %v607_v20 = vadd.f32 %v606_v14, %v1580_v13 }
 0x1a5   :  { %v985_v57 = vld [vmem:[#allocation2 + $0x50] sm:$0xff]  ;;  %v932_v47 = vpop.f32.mrf.mxu1 }
 0x1a6   :  { %1001 = vst.msk [vmem:[%s1751_s2 + $0x50] sm:$0xff] %vm15_vm2, %v985_v57  ;;  %v725_v7 = vadd.f32 %v724_v46, %v607_v20  ;;  %v839_v25 = vpop.f32.mrf.mxu0 }
 0x1a7   :  { %967 = vst.msk [vmem:[#allocation2 + $0x58] sm:$0xff] %vm15_vm2, %v950_v42 }
 0x1a8   :  { %v836_v10 = vadd.f32 %v835_v16, %v725_v7 }
 0x1aa   :  { %v925_v31 = vadd.f32 %v924_v18, %v836_v10  ;;  %v736_v1 = vpop.f32.mrf.mxu3 }
 0x1ab   :  { %v611_v36 = vpop.f32.mrf.mxu2 }
 0x1ac   :  { %v951_v49 = vadd.f32 %v925_v31, %v176_v24  ;;  %v612_v33 = vadd.f32 %v611_v36, %v1609_v28 }
 0x1ad   :  { %v936_v8 = vpop.f32.mrf.mxu1 }
 0x1ae   :  { %v986_v13 = vld [vmem:[#allocation2 + $0x58] sm:$0xff]  ;;  %968 = vst.msk [vmem:[#allocation2 + $0x60] sm:$0xff] %vm15_vm2, %v951_v49  ;;  %v731_v48 = vadd.f32 %v730_v15, %v612_v33  ;;  %v843_v28 = vpop.f32.mrf.mxu0 }
 0x1af   :  { %1002 = vst.msk [vmem:[%s1751_s2 + $0x58] sm:$0xff] %vm15_vm2, %v986_v13 }
 0x1b0   :  { %v840_v53 = vadd.f32 %v839_v25, %v731_v48 }
 0x1b2   :  { %v929_v54 = vadd.f32 %v928_v35, %v840_v53  ;;  %v742_v23 = vpop.f32.mrf.mxu3 }
 0x1b3   :  { %v616_v37 = vpop.f32.mrf.mxu2 }
 0x1b4   :  { %v952_v43 = vadd.f32 %v929_v54, %v177_v27  ;;  %v617_v51 = vadd.f32 %v616_v37, %v1636_v45 }
 0x1b5   :  { %v987_v32 = vld [vmem:[#allocation2 + $0x60] sm:$0xff] }
 0x1b6   :  { %1003 = vst.msk [vmem:[%s1751_s2 + $0x60] sm:$0xff] %vm15_vm2, %v987_v32  ;;  %v737_v52 = vadd.f32 %v736_v1, %v617_v51  ;;  %v847_v3 = vpop.f32.mrf.mxu0 }
 0x1b7   :  { %969 = vst.msk [vmem:[#allocation2 + $0x68] sm:$0xff] %vm15_vm2, %v952_v43 }
 0x1b8   :  { %v844_v58 = vadd.f32 %v843_v28, %v737_v52 }
 0x1ba   :  { %v933_v60 = vadd.f32 %v932_v47, %v844_v58 }
 0x1bb   :  { %v621_v4 = vpop.f32.mrf.mxu2 }
 0x1bc   :  { %v953_v62 = vadd.f32 %v933_v60, %v178_v56  ;;  %v622_v63 = vadd.f32 %v621_v4, %v1643_v55 }
 0x1be   :  { %v988_v45 = vld [vmem:[#allocation2 + $0x68] sm:$0xff]  ;;  %970 = vst.msk [vmem:[#allocation2 + $0x70] sm:$0xff] %vm15_vm2, %v953_v62  ;;  %v743_v0 = vadd.f32 %v742_v23, %v622_v63 }
 0x1bf   :  { %1004 = vst.msk [vmem:[%s1751_s2 + $0x68] sm:$0xff] %vm15_vm2, %v988_v45 }
 0x1c0   :  { %v848_v6 = vadd.f32 %v847_v3, %v743_v0 }
 0x1c2   :  { %v937_v50 = vadd.f32 %v936_v8, %v848_v6 }
 0x1c4   :  { %v954_v2 = vadd.f32 %v937_v50, %v179_v12 }
 0x1c5   :  { %v989_v9 = vld [vmem:[#allocation2 + $0x70] sm:$0xff] }
 0x1c6   :  { %1005 = vst.msk [vmem:[%s1751_s2 + $0x70] sm:$0xff] %vm15_vm2, %v989_v9 }
 0x1c7   :  { %971 = vst.msk [vmem:[#allocation2 + $0x78] sm:$0xff] %vm15_vm2, %v954_v2 }
 0x1ce   :  { %v990_v55 = vld [vmem:[#allocation2 + $0x78] sm:$0xff] }
 0x1cf   :  { %1006 = vst.msk [vmem:[%s1751_s2 + $0x78] sm:$0xff] %vm15_vm2, %v990_v55 }

</bundles_post_ra>
